<compile_context>
chip_gen: v7x
topology: tpu7x:2x2x1
jax: 0.10.0
libtpu: 0.0.40
codegen_flags: <defaults>
</compile_context>

<pallas_src>
import jax
import jax.numpy as jnp
from jax.experimental import pallas as pl
from jax.experimental.pallas import tpu as pltpu

_CHUNK_THRESHOLD_BYTES = 8 * 1024 * 1024   # only split very large copies
_MAX_CHUNKS = 4


def _make_identity_dma_kernel(n_chunks: int, chunk_rows: int, total_rows: int):
    """Build a kernel that copies the whole array HBM->HBM with n_chunks DMAs."""

    def kernel(x_ref, o_ref, sem):
        if n_chunks == 1:
            cp = pltpu.make_async_copy(x_ref, o_ref, sem.at[0])
            cp.start()
            cp.wait()
            return
        # Start all chunked DMAs first (overlap issue latency), then wait.
        copies = []
        for c in range(n_chunks):
            start = c * chunk_rows
            rows = min(chunk_rows, total_rows - start)
            cp = pltpu.make_async_copy(
                x_ref.at[pl.ds(start, rows)],
                o_ref.at[pl.ds(start, rows)],
                sem.at[c],
            )
            cp.start()
            copies.append(cp)
        for cp in copies:
            cp.wait()

    return kernel


def identity_pallas(x: jax.Array) -> jax.Array:
    """Identity forward pass (y = x) via a direct HBM->HBM DMA kernel."""
    if x.size == 0:
        return x

    orig_shape = x.shape
    x_nd = x.reshape(1) if x.ndim == 0 else x
    itemsize = jnp.dtype(x_nd.dtype).itemsize
    nbytes = x_nd.size * itemsize

    lead = x_nd.shape[0]
    if nbytes >= _CHUNK_THRESHOLD_BYTES and lead >= 2:
        n_chunks = min(_MAX_CHUNKS, lead)
        chunk_rows = pl.cdiv(lead, n_chunks)
        n_chunks = pl.cdiv(lead, chunk_rows)   # actual number of chunks used
    else:
        n_chunks = 1
        chunk_rows = lead

    kernel = _make_identity_dma_kernel(n_chunks, chunk_rows, lead)

    out = pl.pallas_call(
        kernel,
        out_shape=jax.ShapeDtypeStruct(x_nd.shape, x_nd.dtype),
        # Raw HBM refs on both sides: no auto-DMA, no VMEM tiling, no grid.
        in_specs=[pl.BlockSpec(memory_space=pl.ANY)],
        out_specs=pl.BlockSpec(memory_space=pl.ANY),
        scratch_shapes=[pltpu.SemaphoreType.DMA((n_chunks,))],
        # Pure memory op: one read + one write of the array, zero flops.
        cost_estimate=pl.CostEstimate(
            flops=0,
            transcendentals=0,
            bytes_accessed=2 * nbytes,
        ),
        compiler_params=pltpu.CompilerParams(has_side_effects=True),
    )(x_nd)

    return out.reshape(orig_shape)


if __name__ == "__main__":
    key = jax.random.PRNGKey(0)
    # Small NCHW input consistent with the module's usage (channel arg unused).
    x = jax.random.normal(key, (2, 4, 16, 16), dtype=jnp.float32)

    y = identity_pallas(x)
    y = jax.block_until_ready(y)

    assert y.shape == x.shape
    assert y.dtype == x.dtype
    assert bool(jnp.array_equal(y, x))

    # Also exercise a ragged / non-128-aligned shape (full-ref DMA handles it
    # without any masked-store fallback).
    x2 = jax.random.normal(jax.random.PRNGKey(1), (3, 5, 7), dtype=jnp.bfloat16)
    y2 = jax.block_until_ready(identity_pallas(x2))
    assert y2.shape == x2.shape and y2.dtype == x2.dtype
    assert bool(jnp.array_equal(y2, x2))

    print("KERNEL_OK")
</pallas_src>

<mosaic_0001>
module attributes {stable_mosaic.version = 11 : i64} {
  func.func @kernel(%arg0: memref<2x4x16x16xf32, #tpu.memory_space<any>>, %arg1: memref<2x4x16x16xf32, #tpu.memory_space<any>>, %arg2: memref<1x!tpu.dma_semaphore, #tpu.memory_space<semaphore_mem>>) attributes {dimension_semantics = [], scalar_prefetch = 0 : i64, scratch_operands = 1 : i64, tpu.core_type = #tpu.core_type<tc>} {
    %c0_i32 = arith.constant 0 : i32
    %0 = tpu.memref_slice %arg2[%c0_i32] : memref<1x!tpu.dma_semaphore, #tpu.memory_space<semaphore_mem>> -> memref<1x!tpu.dma_semaphore, #tpu.memory_space<semaphore_mem>>
    %1 = tpu.memref_squeeze %0 : memref<1x!tpu.dma_semaphore, #tpu.memory_space<semaphore_mem>> -> memref<!tpu.dma_semaphore, #tpu.memory_space<semaphore_mem>>
    tpu.enqueue_dma source(%arg0 : memref<2x4x16x16xf32, #tpu.memory_space<any>>) target(%arg1 : memref<2x4x16x16xf32, #tpu.memory_space<any>>) target_semaphore(%1 : memref<!tpu.dma_semaphore, #tpu.memory_space<semaphore_mem>>)
    %c0_i32_0 = arith.constant 0 : i32
    %2 = tpu.memref_slice %arg2[%c0_i32_0] : memref<1x!tpu.dma_semaphore, #tpu.memory_space<semaphore_mem>> -> memref<1x!tpu.dma_semaphore, #tpu.memory_space<semaphore_mem>>
    %3 = tpu.memref_squeeze %2 : memref<1x!tpu.dma_semaphore, #tpu.memory_space<semaphore_mem>> -> memref<!tpu.dma_semaphore, #tpu.memory_space<semaphore_mem>>
    tpu.wait_dma2 semaphore(%3 : memref<!tpu.dma_semaphore, #tpu.memory_space<semaphore_mem>>) src(%arg0 : memref<2x4x16x16xf32, #tpu.memory_space<any>>) dst(%arg1 : memref<2x4x16x16xf32, #tpu.memory_space<any>>)
    return
  }
}

</mosaic_0001>

<bundles_post_ra>
// kernel: tpu_custom_call.1
= control target key start
LH: loop header
LB: loop body
LE: loop exit
PB: predicated region body
PF: predicated region fallthrough
CT: control target
= control target key end

     0   :  { %s36_s6 = smov [#allocation2]   ;;  %s37_s7 = smov [#allocation3]   ;;  %s55_s0 = inlined_call_operand.hbm [shape: f32[2,4,16,16], index: 0, kind: input, shape index: {}]   ;;  %s56_s1 = inlined_call_operand.hbm [shape: f32[2,4,16,16], index: 1, kind: output, shape index: {}]  }
   0x1   :  { %s38_s8 = smov 0  }
   0x2   :  { %18 = dma.general %s55_s0, 2048, %s56_s1, %s36_s6, %s37_s7, [#allocation4], %s38_s8, 0  }
   0x3   :  { %34 = dma.done.wait [#allocation2], 2048 }
   0x4   :  { %35 = vsyncadd [#allocation2], 4294965248 }
   0x5   :  { %24 = vsyncmov [#allocation2] }
   0x8   :  { %s25_s13 = vpop.sfrf %24 }
   0x9   :  { %p30_p0 = scmp.ne.s32.totalorder %s25_s13, 0 }
   0xb   :  { %29 = shalt.err (%p30_p0)  }

</bundles_post_ra>
